<compile_context>
chip_gen: v5e
topology: v5e:2x2
jax: 0.10.0
libtpu: 0.0.40
codegen_flags: <defaults>
</compile_context>

<pallas_src>
import functools

import jax
import jax.numpy as jnp
from jax import lax
from jax.experimental import pallas as pl
from jax.experimental.pallas import tpu as pltpu

EPS = 1e-5          # nn.InstanceNorm2d default eps
NEG_SLOPE = 0.2     # LeakyReLU slope
KSIZE = 4
STRIDE = 2
PAD = 1


def _cnn_block_kernel(patches_ref, w_ref, gamma_ref, beta_ref, out_ref):
    # patches_ref: (1, K, P)   bf16   K = Cin*4*4 (order cin,kh,kw), P = Hout*Wout
    # w_ref:       (Tc, K)     bf16   Tc = Cout tile (multiple of 8)
    # gamma/beta:  (Tc, 1)     f32
    # out_ref:     (1, Tc, P)  out dtype, NCHW-flat block (lane-dense on P)
    pt = patches_ref[0]                     # (K, P)
    w = w_ref[...]                          # (Tc, K)

    # Convolution as a transposed matmul on the MXU; f32 accumulation.
    y = jnp.dot(w, pt, preferred_element_type=jnp.float32)        # (Tc, P)

    # InstanceNorm2d: per-(sample, channel) stats over spatial positions.
    # Centered variance (numerically safe), biased estimator (matches PyTorch).
    inv_p = 1.0 / y.shape[1]                 # compile-time constant
    mean = jnp.sum(y, axis=1, keepdims=True) * inv_p               # (Tc, 1)
    yc = y - mean
    var = jnp.sum(yc * yc, axis=1, keepdims=True) * inv_p          # (Tc, 1)

    # Affine folded into a single per-channel FMA on the centered tensor.
    scale = gamma_ref[...] * lax.rsqrt(var + EPS)                  # (Tc, 1)
    z = yc * scale + beta_ref[...]                                 # (Tc, P)

    # LeakyReLU(0.2) == max(z, 0.2*z)  (no compare/select needed).
    out_ref[0] = jnp.maximum(z, NEG_SLOPE * z).astype(out_ref.dtype)


def _im2col_kp(x_nchw, ksize, stride, pad):
    """(N, Cin, H, W) -> (N, K, P) with K ordered (cin, kh, kw), P = Hout*Wout.

    Runs in whatever dtype x_nchw already is (caller casts to bf16 first so the
    materialized patches intermediate is bf16).
    """
    n, cin, h, w = x_nchw.shape
    x_pad = jnp.pad(x_nchw, ((0, 0), (0, 0), (pad, pad), (pad, pad)))
    h_out = (h + 2 * pad - ksize) // stride + 1
    w_out = (w + 2 * pad - ksize) // stride + 1
    tiles = []
    for kh in range(ksize):
        for kw in range(ksize):
            sl = x_pad[:, :,
                       kh:kh + stride * (h_out - 1) + 1:stride,
                       kw:kw + stride * (w_out - 1) + 1:stride]  # (N, Cin, Ho, Wo)
            tiles.append(sl)
    # (N, Cin, ksize*ksize, Hout, Wout) -> (N, Cin*ksize*ksize, Hout*Wout)
    patches = jnp.stack(tiles, axis=2)
    return patches.reshape(n, cin * ksize * ksize, h_out * w_out), h_out, w_out


def _pick_cout_tile(cp):
    """Largest channel tile <= 128 (multiple of 8) that divides cp."""
    for t in (128, 64, 32, 16, 8):
        if cp % t == 0:
            return t
    return cp


@functools.partial(jax.jit, static_argnames=("stride",))
def cnn_block_forward(x_nchw, weight, gamma, beta, stride=STRIDE):
    """Matches CnnBlock.forward.  x_nchw: (N, Cin, H, W) -> (N, Cout, Hout, Wout)."""
    n, cin, h, w = x_nchw.shape
    cout = weight.shape[0]
    out_dtype = x_nchw.dtype

    # bf16 BEFORE im2col: the 4x-amplified patches intermediate is written/read
    # from HBM in bf16 instead of f32 (roughly halves the dominant HBM traffic).
    patches, h_out, w_out = _im2col_kp(
        x_nchw.astype(jnp.bfloat16), KSIZE, stride, PAD)
    p_dim = h_out * w_out
    k_dim = KSIZE * KSIZE * cin

    # Channel padding only when Cout is not already a multiple of 8; typical
    # discriminator widths (64/128/256/512) take the no-pad, no-slice path.
    cp = -(-cout // 8) * 8
    tc = _pick_cout_tile(cp)
    n_ct = cp // tc

    # PyTorch conv weight (Cout, Cin, kh, kw) -> (Cout, K); the natural reshape
    # gives K order (cin, kh, kw), matching the im2col flattening.
    w_t = weight.reshape(cout, k_dim).astype(jnp.bfloat16)
    gamma_f = gamma.astype(jnp.float32)
    beta_f = beta.astype(jnp.float32)
    if cp != cout:
        # Padded rows: y==0, gamma==0, beta==0 -> output 0 (var+eps > 0, no NaNs).
        w_t = jnp.pad(w_t, ((0, cp - cout), (0, 0)))
        gamma_f = jnp.pad(gamma_f, (0, cp - cout))
        beta_f = jnp.pad(beta_f, (0, cp - cout))
    gamma_f = gamma_f.reshape(cp, 1)
    beta_f = beta_f.reshape(cp, 1)

    out = pl.pallas_call(
        _cnn_block_kernel,
        out_shape=jax.ShapeDtypeStruct((n, cp, p_dim), out_dtype),
        grid_spec=pltpu.PrefetchScalarGridSpec(
            num_scalar_prefetch=0,
            grid=(n, n_ct),
            in_specs=[
                # Patches block index ignores j -> fetched once per sample even
                # though the inner grid axis iterates over Cout tiles.
                pl.BlockSpec((1, k_dim, p_dim), lambda i, j: (i, 0, 0)),
                pl.BlockSpec((tc, k_dim), lambda i, j: (j, 0)),
                pl.BlockSpec((tc, 1), lambda i, j: (j, 0)),
                pl.BlockSpec((tc, 1), lambda i, j: (j, 0)),
            ],
            out_specs=pl.BlockSpec((1, tc, p_dim), lambda i, j: (i, j, 0)),
        ),
        compiler_params=pltpu.CompilerParams(
            # Both axes are independent -> megacore / v7x two-TC sharding.
            dimension_semantics=("parallel", "parallel"),
            # Above v5e(16 MiB)/v6e(32 MiB) scoped defaults, inside v7x's 64 MiB.
            vmem_limit_bytes=48 * 1024 * 1024,
        ),
    )(patches, w_t, gamma_f, beta_f)

    if cp != cout:
        out = out[:, :cout, :]
    # (N, Cout, P) is already NCHW-flat; unflatten spatial (free reshape).
    return out.reshape(n, cout, h_out, w_out)


def _reference(x, weight, gamma, beta):
    """Pure-JAX reference (conv inputs bf16-quantized to match MXU numerics)."""
    xq = x.astype(jnp.bfloat16).astype(jnp.float32)
    wq = weight.astype(jnp.bfloat16).astype(jnp.float32)
    y = lax.conv_general_dilated(
        xq, wq, window_strides=(STRIDE, STRIDE),
        padding=((PAD, PAD), (PAD, PAD)),
        dimension_numbers=("NCHW", "OIHW", "NCHW"))
    mean = y.mean(axis=(2, 3), keepdims=True)
    var = y.var(axis=(2, 3), keepdims=True)
    yh = (y - mean) / jnp.sqrt(var + EPS)
    z = yh * gamma.reshape(1, -1, 1, 1) + beta.reshape(1, -1, 1, 1)
    return jnp.where(z >= 0, z, NEG_SLOPE * z)


if __name__ == "__main__":
    # Small shapes consistent with the module: batch=2, in_ch=4, out_ch=8, 16x16.
    N, CIN, COUT, H, W = 2, 4, 8, 16, 16

    key = jax.random.PRNGKey(0)
    kx, kw = jax.random.split(key)

    x = jax.random.normal(kx, (N, CIN, H, W), dtype=jnp.float32)

    # Conv weight: (Cout, Cin, 4, 4), deterministic (kaiming-uniform-like bound).
    fan_in = CIN * KSIZE * KSIZE
    bound = (1.0 / fan_in) ** 0.5
    weight = jax.random.uniform(
        kw, (COUT, CIN, KSIZE, KSIZE), dtype=jnp.float32,
        minval=-bound, maxval=bound)

    # InstanceNorm2d affine params: PyTorch default init (weight=1, bias=0).
    gamma = jnp.ones((COUT,), dtype=jnp.float32)
    beta = jnp.zeros((COUT,), dtype=jnp.float32)

    y = cnn_block_forward(x, weight, gamma, beta)
    jax.block_until_ready(y)
    assert y.shape == (N, COUT, H // 2, W // 2), y.shape

    y_ref = _reference(x, weight, gamma, beta)
    assert jnp.allclose(y, y_ref, atol=5e-2, rtol=5e-2), (
        float(jnp.max(jnp.abs(y - y_ref))))
    print("KERNEL_OK")
</pallas_src>

<mosaic_0001>
module attributes {stable_mosaic.version = 11 : i64} {
  func.func @_cnn_block_kernel(%arg0: i32, %arg1: i32, %arg2: memref<1x64x64xbf16, #tpu.memory_space<vmem>>, %arg3: memref<8x64xbf16, #tpu.memory_space<vmem>>, %arg4: memref<8x1xf32, #tpu.memory_space<vmem>>, %arg5: memref<8x1xf32, #tpu.memory_space<vmem>>, %arg6: memref<1x8x64xf32, #tpu.memory_space<vmem>>) attributes {dimension_semantics = [#tpu.dimension_semantics<parallel>, #tpu.dimension_semantics<parallel>], iteration_bounds = array<i64: 2, 1>, scalar_prefetch = 0 : i64, scratch_operands = 0 : i64, tpu.core_type = #tpu.core_type<tc>, window_params = [{transform_indices = @transform_0, window_bounds = array<i64: 1, 64, 64>}, {transform_indices = @transform_1, window_bounds = array<i64: 8, 64>}, {transform_indices = @transform_2, window_bounds = array<i64: 8, 1>}, {transform_indices = @transform_3, window_bounds = array<i64: 8, 1>}, {transform_indices = @transform_4, window_bounds = array<i64: 1, 8, 64>}]} {
    %c0 = arith.constant 0 : index
    %c0_0 = arith.constant 0 : index
    %c0_1 = arith.constant 0 : index
    %0 = vector.load %arg2[%c0, %c0_0, %c0_1] : memref<1x64x64xbf16, #tpu.memory_space<vmem>>, vector<1x64x64xbf16>
    %1 = vector.shape_cast %0 : vector<1x64x64xbf16> to vector<64x64xbf16>
    %c0_2 = arith.constant 0 : index
    %c0_3 = arith.constant 0 : index
    %2 = vector.load %arg3[%c0_2, %c0_3] : memref<8x64xbf16, #tpu.memory_space<vmem>>, vector<8x64xbf16>
    %cst = arith.constant dense<0.000000e+00> : vector<8x64xf32>
    %3 = tpu.matmul %2, %1, %cst {dimension_numbers = #tpu.dot_dimension_numbers<[1], [0], [0], [1], [0, 0, 1, 1], [], []>} : vector<8x64xbf16>, vector<64x64xbf16>, vector<8x64xf32> -> vector<8x64xf32>
    %cst_4 = arith.constant dense<0.000000e+00> : vector<8xf32>
    %4 = vector.multi_reduction <add>, %3, %cst_4 [1] : vector<8x64xf32> to vector<8xf32>
    %5 = vector.shape_cast %4 : vector<8xf32> to vector<8x1xf32>
    %cst_5 = arith.constant 1.562500e-02 : f32
    %6 = vector.broadcast %cst_5 : f32 to vector<8x1xf32>
    %7 = arith.mulf %5, %6 : vector<8x1xf32>
    %8 = vector.broadcast %7 : vector<8x1xf32> to vector<8x64xf32>
    %9 = arith.subf %3, %8 : vector<8x64xf32>
    %10 = arith.mulf %9, %9 : vector<8x64xf32>
    %cst_6 = arith.constant dense<0.000000e+00> : vector<8xf32>
    %11 = vector.multi_reduction <add>, %10, %cst_6 [1] : vector<8x64xf32> to vector<8xf32>
    %12 = vector.shape_cast %11 : vector<8xf32> to vector<8x1xf32>
    %cst_7 = arith.constant 1.562500e-02 : f32
    %13 = vector.broadcast %cst_7 : f32 to vector<8x1xf32>
    %14 = arith.mulf %12, %13 : vector<8x1xf32>
    %c0_8 = arith.constant 0 : index
    %c0_9 = arith.constant 0 : index
    %15 = vector.load %arg4[%c0_8, %c0_9] : memref<8x1xf32, #tpu.memory_space<vmem>>, vector<8x1xf32>
    %cst_10 = arith.constant 9.99999974E-6 : f32
    %16 = vector.broadcast %cst_10 : f32 to vector<8x1xf32>
    %17 = arith.addf %14, %16 : vector<8x1xf32>
    %18 = math.rsqrt %17 : vector<8x1xf32>
    %19 = arith.mulf %15, %18 : vector<8x1xf32>
    %20 = vector.broadcast %19 : vector<8x1xf32> to vector<8x64xf32>
    %21 = arith.mulf %9, %20 : vector<8x64xf32>
    %c0_11 = arith.constant 0 : index
    %c0_12 = arith.constant 0 : index
    %22 = vector.load %arg5[%c0_11, %c0_12] : memref<8x1xf32, #tpu.memory_space<vmem>>, vector<8x1xf32>
    %23 = vector.broadcast %22 : vector<8x1xf32> to vector<8x64xf32>
    %24 = arith.addf %21, %23 : vector<8x64xf32>
    %cst_13 = arith.constant 2.000000e-01 : f32
    %25 = vector.broadcast %cst_13 : f32 to vector<8x64xf32>
    %26 = arith.mulf %25, %24 : vector<8x64xf32>
    %27 = arith.maximumf %24, %26 : vector<8x64xf32>
    %c0_14 = arith.constant 0 : index
    %c0_15 = arith.constant 0 : index
    %c0_16 = arith.constant 0 : index
    %28 = vector.load %arg6[%c0_14, %c0_15, %c0_16] : memref<1x8x64xf32, #tpu.memory_space<vmem>>, vector<1x8x64xf32>
    %29 = vector.shape_cast %28 : vector<1x8x64xf32> to vector<8x64xf32>
    %30 = vector.shape_cast %27 : vector<8x64xf32> to vector<1x8x64xf32>
    tpu.vector_store %arg6[%c0_14, %c0_15, %c0_16], %30 {strides = array<i32>} : memref<1x8x64xf32, #tpu.memory_space<vmem>>, vector<1x8x64xf32>,
    return
  }
  func.func @transform_0(%arg0: i32, %arg1: i32) -> (i32, i32, i32) {
    %c0_i32 = arith.constant 0 : i32
    %c0_i32_0 = arith.constant 0 : i32
    %c0_i32_1 = arith.constant 0 : i32
    return %arg0, %c0_i32, %c0_i32_0 : i32, i32, i32
  }
  func.func @transform_1(%arg0: i32, %arg1: i32) -> (i32, i32) {
    %c0_i32 = arith.constant 0 : i32
    %c0_i32_0 = arith.constant 0 : i32
    return %arg1, %c0_i32 : i32, i32
  }
  func.func @transform_2(%arg0: i32, %arg1: i32) -> (i32, i32) {
    %c0_i32 = arith.constant 0 : i32
    %c0_i32_0 = arith.constant 0 : i32
    return %arg1, %c0_i32 : i32, i32
  }
  func.func @transform_3(%arg0: i32, %arg1: i32) -> (i32, i32) {
    %c0_i32 = arith.constant 0 : i32
    %c0_i32_0 = arith.constant 0 : i32
    return %arg1, %c0_i32 : i32, i32
  }
  func.func @transform_4(%arg0: i32, %arg1: i32) -> (i32, i32, i32) {
    %c0_i32 = arith.constant 0 : i32
    %c0_i32_0 = arith.constant 0 : i32
    return %arg0, %arg1, %c0_i32 : i32, i32, i32
  }
}

</mosaic_0001>

<bundles_post_ra>
// kernel: cnn_block_forward.1
= control target key start
LH: loop header
LB: loop body
LE: loop exit
PB: predicated region body
PF: predicated region fallthrough
CT: control target
= control target key end

     0   :  { %s588_s15 = smov 0   ;;  %s590_s16 = smov 0   ;;  %s638_s0 = inlined_call_operand.vmem [shape: bf16[2,64,64], index: 0, kind: input, shape index: {}]   ;;  %s639_s1 = inlined_call_operand.vmem [shape: bf16[8,64], index: 1, kind: input, shape index: {}]   ;;  %s640_s2 = inlined_call_operand.vmem [shape: f32[8,1], index: 2, kind: input, shape index: {}]   ;;  %s641_s3 = inlined_call_operand.vmem [shape: f32[8,1], index: 3, kind: input, shape index: {}]   ;;  %s642_s4 = inlined_call_operand.vmem [shape: f32[2,8,64], index: 4, kind: output, shape index: {}]  }
   0x1   :  { %s592_s17 = smov 0  }
   0x2 LB: > { %s26_s18 = sadd.s32 1, %s556_s16  ;;  %p481_p0 = scmp.ge.s32.totalorder %s560_s17, 1  ;;  %s560_s17 = sphi %s592_s17, %s14_s17   ;;  %s556_s16 = sphi %s590_s16, %s644_s16   ;;  %s552_s15 = sphi %s588_s15, %s643_s15  }
   0x3   : > { %p28_p1 = scmp.ge.s32.totalorder %s26_s18, 2  ;;  %p203_p2 = scmp.lt.s32.totalorder %s560_s17, 3 }
   0x5   : > { %s646_s18 = smov (%p28_p1, %s26_s18), 0  ;;  %p204_p3 = pnand %p481_p0, %p203_p2 }
   0x6   : > { %p243_p4 = scmp.lt.s32.totalorder (!%p204_p3), %s552_s15, 1 }
   0x7   : > { %207 = sbr.rel (%p204_p3) target bundleno = 551 (0x227), region = 36 }
   0xc   : > { %s648_s15 = smov (!%p243_p4, %s552_s15), 1  ;;  %v276_v4 = vld [vmem:[%s639_s1] sm:$0xf]  ;;  %vm301_vm0 = vcmask 523264   ;;  %v562_v13 = vmov 0  }
   0xd   : > { %s504_s19 = sshll.u32 %s648_s15, 5  ;;  %534 = vset.pattern.permute.xlu1 %v562_v13  ;;  %535 = vset.pattern.permute.xlu0 %v562_v13  ;;  %v328_v22 = vld [vmem:[%s640_s2] sm:$0xff]  ;;  %s484_s29 = sshll.u32 %s648_s15, 3 }
   0xe   : > { %s247_s22 = scalar_lea.vmem %s638_s0, %s504_s19  ;;  %v347_v26 = vld [vmem:[%s641_s3] sm:$0xff]  ;;  %s266_s6 = scalar_lea.vmem %s642_s4, %s484_s29 }
   0xf   : > { %v508_v0 = vld [vmem:[%s247_s22 + $0x18] sm:$0xff]  ;;  %v507_v1 = vld [vmem:[%s247_s22 + $0x10] sm:$0xff]  ;;  %v506_v2 = vld [vmem:[%s247_s22 + $0x8] sm:$0xff] }
  0x10   : > { %309 = vmatpush.bf16.msra.mxu0 %v508_v0  ;;  %v505_v3 = vld [vmem:[%s247_s22] sm:$0xff] }
  0x14   : > { %310 = vmatpush.bf16.msra.mxu0 %v507_v1 }
  0x18   : > { %311 = vmatpush.bf16.msra.mxu0 %v506_v2 }
  0x1c   : > { %312 = vmatpush.bf16.msra.mxu0 %v505_v3 }
  0x1f   : > { %501 = vmatmul.msk.bf16.vlgmr.msra.gmra.mxu0 %vm301_vm0, %v276_v4 }
  0x9c   : > { %v314_v5 = vpop.f32.mrf.mxu0 }
  0x9d   : > { %v318_v6 = vsel %vm301_vm0, %v314_v5, 0.0 }
  0x9e   : > { %319 = vadd.xlane.f32.xlu0 %v318_v6 }
  0xa4   : > { %v316_v7 = vpop.f32.mrf.mxu0 }
 0x111   : > { %v320_v8 = vpop.xlane.xlu0 %319 }
 0x112   : > { %v321_v9 = vmul.f32 0.015625, %v320_v8 }
 0x114   : > { %v322_v10 = vsub.f32 %v314_v5, %v321_v9 }
 0x116   : > { %v323_v11 = vmul.f32 %v322_v10, %v322_v10 }
 0x118   : > { %v324_v12 = vsel %vm301_vm0, %v323_v11, 0.0 }
 0x119   : > { %325 = vadd.xlane.f32.xlu0 %v324_v12 }
 0x18c   : > { %v326_v14 = vpop.xlane.xlu0 %325 }
 0x18d   : > { %v327_v15 = vmul.f32 0.015625, %v326_v14 }
 0x18f   : > { %v329_v16 = vadd.f32 1e-05, %v327_v15 }
 0x191   : > { %536 = vrsqrt.f32 %v329_v16  ;;  %vm336_vm2 = vweird.f32 %v329_v16 }
 0x197   : > { %v537_v17 = vpop.eup %536 }
 0x198   : > { %v331_v18 = vmul.f32 %v537_v17, %v329_v16  ;;  %vm337_vm1 = vweird.f32 %v537_v17 }
 0x199   : > { %vm338_vm3 = vmor %vm336_vm2, %vm337_vm1 }
 0x19a   : > { %v332_v19 = vmul.f32 %v537_v17, %v331_v18 }
 0x19c   : > { %v333_v20 = vmul.f32 0.5, %v332_v19 }
 0x19e   : > { %v334_v21 = vsub.f32 1.5, %v333_v20 }
 0x1a0   : > { %v335_v23 = vmul.f32 %v537_v17, %v334_v21 }
 0x1a2   : > { %v339_v24 = vsel %vm338_vm3, %v537_v17, %v335_v23 }
 0x1a3   : > { %v340_v25 = vmul.f32 %v339_v24, %v328_v22 }
 0x1a5   : > { %343 = vperm.xlu1 %534, %v340_v25  }
 0x1ad   : > { %350 = vperm.xlu1 %534, %v347_v26  }
 0x217   : > { %v344_v27 = vpop.permute.xlu1 %343 }
 0x218   : > { %v346_v28 = vmul.f32 %v344_v27, %v322_v10 }
 0x21f   : > { %v351_v29 = vpop.permute.xlu1 %350 }
 0x220   : > { %v353_v30 = vadd.f32 %v351_v29, %v346_v28 }
 0x222   : > { %v354_v31 = vmul.f32 0.2, %v353_v30 }
 0x224   : > { %v355_v32 = vmax.f32 %v353_v30, %v354_v31 }
 0x226   : > { %356 = vst.msk [vmem:[%s266_s6] sm:$0xff] %vm301_vm0, %v355_v32 }
 0x227 PF: > { %s14_s17 = sadd.s32 1, %s560_s17   ;;  %s643_s15 = smov %s556_s16 }
 0x228   : > { %p11_p5 = scmp.ge.s32.totalorder %s14_s17, 4   ;;  %s644_s16 = smov %s646_s18 }
 0x22a   :  { %13 = sbr.rel (!%p11_p5) target bundleno = 2 (0x2), region = 75 }

</bundles_post_ra>
